<compile_context>
chip_gen: v7x
topology: tpu7x:2x2x1
jax: 0.10.0
libtpu: 0.0.40
codegen_flags: <defaults>
</compile_context>

<pallas_src>
import jax
import jax.numpy as jnp
from jax.experimental import pallas as pl
from jax.experimental.pallas import tpu as pltpu

# ---------------- model hyper-params (small, synthetic) ----------------
B = 2          # batch
C_IN = 4       # input channels
H = W = 16     # spatial
P = 4          # patch size (conv kernel == stride)
N = (H // P) * (W // P)          # tokens per image = 16
K = C_IN * P * P                 # flattened patch dim = 64
KP = 128                         # K zero-padded to full lane width (exact for the dot)
D = 32                           # embed dim
DH = 64                          # RWKV channel-mix hidden dim
EPS = 1e-5


# ---------------- math helpers (shared by kernel and reference) ----------------
def _layernorm(x, gamma, beta):
    # single-pass LN: two independent cross-lane reductions.
    # NOTE: E[x^2]-mu^2 is cancellation-prone for activations with mean >> spread;
    # fine for this synthetic init (and identical math in kernel and reference).
    inv_d = 1.0 / D
    mu = jnp.sum(x, axis=-1, keepdims=True) * inv_d
    ex2 = jnp.sum(x * x, axis=-1, keepdims=True) * inv_d
    var = ex2 - mu * mu
    return (x - mu) * jax.lax.rsqrt(var + EPS) * gamma + beta


def _channel_mix(x, gamma, beta, wk, wv):
    # RWKV-style channel mix: LN -> Linear -> squared ReLU -> Linear + residual
    # (matmul operands bf16, accumulation f32; elementwise math f32)
    xn = _layernorm(x, gamma, beta)
    k = jnp.dot(xn.astype(jnp.bfloat16), wk, preferred_element_type=jnp.float32)
    k = jnp.maximum(k, 0.0)
    k = k * k
    return x + jnp.dot(k.astype(jnp.bfloat16), wv, preferred_element_type=jnp.float32)


# ---------------- fused kernel (single grid step, batch folded into tokens) ----------------
def _fused_kernel(patch_ref, wp_ref, wk_ref, wv_ref, vec_ref, out_ref):
    # patch_ref: (B*N, KP) bf16  | wp_ref: (KP, D) bf16 (row K carries the patch bias)
    # wk_ref:    (2, D, DH) bf16 | wv_ref: (2, DH, D) bf16
    # vec_ref:   (8, D) f32 rows = [g1, b1, g2, b2, gf, bf, pad, pad]
    vec = vec_ref[...]
    # patch embedding + bias in one MXU pass (lane K of every patch row is 1.0)
    x = jnp.dot(patch_ref[...], wp_ref[...], preferred_element_type=jnp.float32)
    # two RWKV channel-mix blocks
    x = _channel_mix(x, vec[0:1, :], vec[1:2, :], wk_ref[0], wv_ref[0])
    x = _channel_mix(x, vec[2:3, :], vec[3:4, :], wk_ref[1], wv_ref[1])
    # final LN
    x = _layernorm(x, vec[4:5, :], vec[5:6, :])
    # avg_layer: mean over tokens per image, vectorized, single full-tile store
    out_ref[...] = jnp.mean(x.reshape(B, N, D), axis=1)


_COST = pl.CostEstimate(flops=150_000, transcendentals=3 * B * N, bytes_accessed=33_000)


def _extract_patches(image):
    # image: NCHW [B, C, H, W] -> patches [B*N, KP] (c, kh, kw ordering, matching a
    # flattened PyTorch Conv2d weight [D, C, P, P]).  Lane K is set to 1.0 so the patch
    # bias (stored in row K of w_patch) rides the MXU pass; remaining pad lanes are 0.
    b, c, h, w = image.shape
    x = image.reshape(b, c, h // P, P, w // P, P)
    x = jnp.transpose(x, (0, 2, 4, 1, 3, 5))                     # [B, H/P, W/P, C, P, P]
    x = x.reshape(b * (h // P) * (w // P), c * P * P)            # [B*N, K]
    ones = jnp.ones((x.shape[0], 1), x.dtype)
    zeros = jnp.zeros((x.shape[0], KP - K - 1), x.dtype)
    x = jnp.concatenate([x, ones, zeros], axis=-1)               # [B*N, KP]
    return x.astype(jnp.bfloat16)


@jax.jit
def warper_clip_v_t_rwkv_forward(image, params):
    patches = _extract_patches(image)                            # fuses with the call under jit
    grid_spec = pltpu.PrefetchScalarGridSpec(
        num_scalar_prefetch=0,
        grid=(1,),
        in_specs=[
            pl.BlockSpec((B * N, KP), lambda i: (0, 0)),         # patches
            pl.BlockSpec((KP, D), lambda i: (0, 0)),             # w_patch (+ bias row)
            pl.BlockSpec((2, D, DH), lambda i: (0, 0, 0)),       # wk stack
            pl.BlockSpec((2, DH, D), lambda i: (0, 0, 0)),       # wv stack
            pl.BlockSpec((8, D), lambda i: (0, 0)),              # coalesced LN params
        ],
        out_specs=pl.BlockSpec((B, D), lambda i: (0, 0)),
    )
    return pl.pallas_call(
        _fused_kernel,
        out_shape=jax.ShapeDtypeStruct((B, D), jnp.float32),
        grid_spec=grid_spec,
        compiler_params=pltpu.CompilerParams(dimension_semantics=("arbitrary",)),
        cost_estimate=_COST,
    )(patches, params["w_patch"], params["wk"], params["wv"], params["vec"])


def init_params(key):
    ks = jax.random.split(key, 5)
    w_patch = jax.random.normal(ks[0], (K, D), jnp.float32) * 0.05
    b_patch = jax.random.normal(ks[1], (D,), jnp.float32) * 0.02
    wp = jnp.zeros((KP, D), jnp.float32)
    wp = wp.at[:K].set(w_patch).at[K].set(b_patch)               # bias folded into pad row K
    wk = jax.random.normal(ks[2], (2, D, DH), jnp.float32) * 0.05
    wv = jax.random.normal(ks[3], (2, DH, D), jnp.float32) * 0.05
    # coalesced LN params, rows: 0=g1, 1=b1, 2=g2, 3=b2, 4=gf, 5=bf, 6..7=pad
    vec = jax.random.normal(ks[4], (8, D), jnp.float32) * 0.02
    vec = vec.at[0].add(1.0).at[2].add(1.0).at[4].add(1.0)       # gammas around 1
    vec = vec.at[6].set(0.0).at[7].set(0.0)
    return {
        "w_patch": wp.astype(jnp.bfloat16),
        "wk": wk.astype(jnp.bfloat16),
        "wv": wv.astype(jnp.bfloat16),
        "vec": vec,
    }


def reference_forward(image, params):
    # pure-JAX reference with the same bf16-operand / f32-accumulate matmul precision
    x = _extract_patches(image)                                  # [B*N, KP]
    vec = params["vec"]
    x = jnp.dot(x, params["w_patch"], preferred_element_type=jnp.float32)
    x = _channel_mix(x, vec[0:1, :], vec[1:2, :], params["wk"][0], params["wv"][0])
    x = _channel_mix(x, vec[2:3, :], vec[3:4, :], params["wk"][1], params["wv"][1])
    x = _layernorm(x, vec[4:5, :], vec[5:6, :])
    return x.reshape(B, N, D).mean(axis=1)                       # avg_layer(...)[-1]


if __name__ == "__main__":
    key = jax.random.PRNGKey(0)
    k_img, k_par = jax.random.split(key)
    image = jax.random.normal(k_img, (B, C_IN, H, W), jnp.float32)  # NCHW like PyTorch
    params = init_params(k_par)

    out = jax.block_until_ready(warper_clip_v_t_rwkv_forward(image, params))
    ref = reference_forward(image, params)
    assert out.shape == (B, D)
    assert jnp.allclose(out, ref, atol=2e-3, rtol=2e-3), "mismatch vs JAX reference"

    print("KERNEL_OK")
</pallas_src>

<mosaic_0001>
module attributes {stable_mosaic.version = 11 : i64} {
  func.func @_fused_kernel(%arg0: i32, %arg1: memref<32x128xbf16, #tpu.memory_space<vmem>>, %arg2: memref<128x32xbf16, #tpu.memory_space<vmem>>, %arg3: memref<2x32x64xbf16, #tpu.memory_space<vmem>>, %arg4: memref<2x64x32xbf16, #tpu.memory_space<vmem>>, %arg5: memref<8x32xf32, #tpu.memory_space<vmem>>, %arg6: memref<2x32xf32, #tpu.memory_space<vmem>>) attributes {dimension_semantics = [#tpu.dimension_semantics<arbitrary>], iteration_bounds = array<i64: 1>, scalar_prefetch = 0 : i64, scratch_operands = 0 : i64, tpu.core_type = #tpu.core_type<tc>, window_params = [{pipeline_mode = #tpu.pipeline_mode<synchronous>, transform_indices = @transform_0, window_bounds = array<i64: 32, 128>}, {pipeline_mode = #tpu.pipeline_mode<synchronous>, transform_indices = @transform_1, window_bounds = array<i64: 128, 32>}, {pipeline_mode = #tpu.pipeline_mode<synchronous>, transform_indices = @transform_2, window_bounds = array<i64: 2, 32, 64>}, {pipeline_mode = #tpu.pipeline_mode<synchronous>, transform_indices = @transform_3, window_bounds = array<i64: 2, 64, 32>}, {pipeline_mode = #tpu.pipeline_mode<synchronous>, transform_indices = @transform_4, window_bounds = array<i64: 8, 32>}, {pipeline_mode = #tpu.pipeline_mode<synchronous>, transform_indices = @transform_5, window_bounds = array<i64: 2, 32>}]} {
    %c0 = arith.constant 0 : index
    %c0_0 = arith.constant 0 : index
    %0 = vector.load %arg5[%c0, %c0_0] : memref<8x32xf32, #tpu.memory_space<vmem>>, vector<8x32xf32>
    %c0_1 = arith.constant 0 : index
    %c0_2 = arith.constant 0 : index
    %1 = vector.load %arg1[%c0_1, %c0_2] : memref<32x128xbf16, #tpu.memory_space<vmem>>, vector<32x128xbf16>
    %c0_3 = arith.constant 0 : index
    %c0_4 = arith.constant 0 : index
    %2 = vector.load %arg2[%c0_3, %c0_4] : memref<128x32xbf16, #tpu.memory_space<vmem>>, vector<128x32xbf16>
    %cst = arith.constant dense<0.000000e+00> : vector<32x32xf32>
    %3 = tpu.matmul %1, %2, %cst {dimension_numbers = #tpu.dot_dimension_numbers<[1], [0], [0], [1], [0, 0, 1, 1], [], []>} : vector<32x128xbf16>, vector<128x32xbf16>, vector<32x32xf32> -> vector<32x32xf32>
    %4 = vector.extract_strided_slice %0 {offsets = [0, 0], sizes = [1, 32], strides = [1, 1]} : vector<8x32xf32> to vector<1x32xf32>
    %5 = vector.extract_strided_slice %0 {offsets = [1, 0], sizes = [1, 32], strides = [1, 1]} : vector<8x32xf32> to vector<1x32xf32>
    %c0_5 = arith.constant 0 : index
    %c0_6 = arith.constant 0 : index
    %c0_7 = arith.constant 0 : index
    %6 = vector.load %arg3[%c0_5, %c0_6, %c0_7] : memref<2x32x64xbf16, #tpu.memory_space<vmem>>, vector<1x32x64xbf16>
    %7 = vector.shape_cast %6 : vector<1x32x64xbf16> to vector<32x64xbf16>
    %c0_8 = arith.constant 0 : index
    %c0_9 = arith.constant 0 : index
    %c0_10 = arith.constant 0 : index
    %8 = vector.load %arg4[%c0_8, %c0_9, %c0_10] : memref<2x64x32xbf16, #tpu.memory_space<vmem>>, vector<1x64x32xbf16>
    %9 = vector.shape_cast %8 : vector<1x64x32xbf16> to vector<64x32xbf16>
    %cst_11 = arith.constant dense<0.000000e+00> : vector<32xf32>
    %10 = vector.multi_reduction <add>, %3, %cst_11 [1] : vector<32x32xf32> to vector<32xf32>
    %11 = vector.shape_cast %10 : vector<32xf32> to vector<32x1xf32>
    %cst_12 = arith.constant 3.125000e-02 : f32
    %12 = vector.broadcast %cst_12 : f32 to vector<32x1xf32>
    %13 = arith.mulf %11, %12 : vector<32x1xf32>
    %14 = arith.mulf %3, %3 : vector<32x32xf32>
    %cst_13 = arith.constant dense<0.000000e+00> : vector<32xf32>
    %15 = vector.multi_reduction <add>, %14, %cst_13 [1] : vector<32x32xf32> to vector<32xf32>
    %16 = vector.shape_cast %15 : vector<32xf32> to vector<32x1xf32>
    %cst_14 = arith.constant 3.125000e-02 : f32
    %17 = vector.broadcast %cst_14 : f32 to vector<32x1xf32>
    %18 = arith.mulf %16, %17 : vector<32x1xf32>
    %19 = arith.mulf %13, %13 : vector<32x1xf32>
    %20 = arith.subf %18, %19 : vector<32x1xf32>
    %21 = vector.broadcast %13 : vector<32x1xf32> to vector<32x32xf32>
    %22 = arith.subf %3, %21 : vector<32x32xf32>
    %cst_15 = arith.constant 9.99999974E-6 : f32
    %23 = vector.broadcast %cst_15 : f32 to vector<32x1xf32>
    %24 = arith.addf %20, %23 : vector<32x1xf32>
    %25 = math.rsqrt %24 : vector<32x1xf32>
    %26 = vector.broadcast %25 : vector<32x1xf32> to vector<32x32xf32>
    %27 = arith.mulf %22, %26 : vector<32x32xf32>
    %28 = vector.broadcast %4 : vector<1x32xf32> to vector<32x32xf32>
    %29 = arith.mulf %27, %28 : vector<32x32xf32>
    %30 = vector.broadcast %5 : vector<1x32xf32> to vector<32x32xf32>
    %31 = arith.addf %29, %30 : vector<32x32xf32>
    %32 = arith.truncf %31 : vector<32x32xf32> to vector<32x32xbf16>
    %cst_16 = arith.constant dense<0.000000e+00> : vector<32x64xf32>
    %33 = tpu.matmul %32, %7, %cst_16 {dimension_numbers = #tpu.dot_dimension_numbers<[1], [0], [0], [1], [0, 0, 1, 1], [], []>} : vector<32x32xbf16>, vector<32x64xbf16>, vector<32x64xf32> -> vector<32x64xf32>
    %cst_17 = arith.constant 0.000000e+00 : f32
    %34 = vector.broadcast %cst_17 : f32 to vector<32x64xf32>
    %35 = arith.maximumf %33, %34 : vector<32x64xf32>
    %36 = arith.mulf %35, %35 : vector<32x64xf32>
    %37 = arith.truncf %36 : vector<32x64xf32> to vector<32x64xbf16>
    %cst_18 = arith.constant dense<0.000000e+00> : vector<32x32xf32>
    %38 = tpu.matmul %37, %9, %cst_18 {dimension_numbers = #tpu.dot_dimension_numbers<[1], [0], [0], [1], [0, 0, 1, 1], [], []>} : vector<32x64xbf16>, vector<64x32xbf16>, vector<32x32xf32> -> vector<32x32xf32>
    %39 = arith.addf %3, %38 : vector<32x32xf32>
    %40 = vector.extract_strided_slice %0 {offsets = [2, 0], sizes = [1, 32], strides = [1, 1]} : vector<8x32xf32> to vector<1x32xf32>
    %41 = vector.extract_strided_slice %0 {offsets = [3, 0], sizes = [1, 32], strides = [1, 1]} : vector<8x32xf32> to vector<1x32xf32>
    %c1 = arith.constant 1 : index
    %c0_19 = arith.constant 0 : index
    %c0_20 = arith.constant 0 : index
    %42 = vector.load %arg3[%c1, %c0_19, %c0_20] : memref<2x32x64xbf16, #tpu.memory_space<vmem>>, vector<1x32x64xbf16>
    %43 = vector.shape_cast %42 : vector<1x32x64xbf16> to vector<32x64xbf16>
    %c1_21 = arith.constant 1 : index
    %c0_22 = arith.constant 0 : index
    %c0_23 = arith.constant 0 : index
    %44 = vector.load %arg4[%c1_21, %c0_22, %c0_23] : memref<2x64x32xbf16, #tpu.memory_space<vmem>>, vector<1x64x32xbf16>
    %45 = vector.shape_cast %44 : vector<1x64x32xbf16> to vector<64x32xbf16>
    %cst_24 = arith.constant dense<0.000000e+00> : vector<32xf32>
    %46 = vector.multi_reduction <add>, %39, %cst_24 [1] : vector<32x32xf32> to vector<32xf32>
    %47 = vector.shape_cast %46 : vector<32xf32> to vector<32x1xf32>
    %cst_25 = arith.constant 3.125000e-02 : f32
    %48 = vector.broadcast %cst_25 : f32 to vector<32x1xf32>
    %49 = arith.mulf %47, %48 : vector<32x1xf32>
    %50 = arith.mulf %39, %39 : vector<32x32xf32>
    %cst_26 = arith.constant dense<0.000000e+00> : vector<32xf32>
    %51 = vector.multi_reduction <add>, %50, %cst_26 [1] : vector<32x32xf32> to vector<32xf32>
    %52 = vector.shape_cast %51 : vector<32xf32> to vector<32x1xf32>
    %cst_27 = arith.constant 3.125000e-02 : f32
    %53 = vector.broadcast %cst_27 : f32 to vector<32x1xf32>
    %54 = arith.mulf %52, %53 : vector<32x1xf32>
    %55 = arith.mulf %49, %49 : vector<32x1xf32>
    %56 = arith.subf %54, %55 : vector<32x1xf32>
    %57 = vector.broadcast %49 : vector<32x1xf32> to vector<32x32xf32>
    %58 = arith.subf %39, %57 : vector<32x32xf32>
    %cst_28 = arith.constant 9.99999974E-6 : f32
    %59 = vector.broadcast %cst_28 : f32 to vector<32x1xf32>
    %60 = arith.addf %56, %59 : vector<32x1xf32>
    %61 = math.rsqrt %60 : vector<32x1xf32>
    %62 = vector.broadcast %61 : vector<32x1xf32> to vector<32x32xf32>
    %63 = arith.mulf %58, %62 : vector<32x32xf32>
    %64 = vector.broadcast %40 : vector<1x32xf32> to vector<32x32xf32>
    %65 = arith.mulf %63, %64 : vector<32x32xf32>
    %66 = vector.broadcast %41 : vector<1x32xf32> to vector<32x32xf32>
    %67 = arith.addf %65, %66 : vector<32x32xf32>
    %68 = arith.truncf %67 : vector<32x32xf32> to vector<32x32xbf16>
    %cst_29 = arith.constant dense<0.000000e+00> : vector<32x64xf32>
    %69 = tpu.matmul %68, %43, %cst_29 {dimension_numbers = #tpu.dot_dimension_numbers<[1], [0], [0], [1], [0, 0, 1, 1], [], []>} : vector<32x32xbf16>, vector<32x64xbf16>, vector<32x64xf32> -> vector<32x64xf32>
    %cst_30 = arith.constant 0.000000e+00 : f32
    %70 = vector.broadcast %cst_30 : f32 to vector<32x64xf32>
    %71 = arith.maximumf %69, %70 : vector<32x64xf32>
    %72 = arith.mulf %71, %71 : vector<32x64xf32>
    %73 = arith.truncf %72 : vector<32x64xf32> to vector<32x64xbf16>
    %cst_31 = arith.constant dense<0.000000e+00> : vector<32x32xf32>
    %74 = tpu.matmul %73, %45, %cst_31 {dimension_numbers = #tpu.dot_dimension_numbers<[1], [0], [0], [1], [0, 0, 1, 1], [], []>} : vector<32x64xbf16>, vector<64x32xbf16>, vector<32x32xf32> -> vector<32x32xf32>
    %75 = arith.addf %39, %74 : vector<32x32xf32>
    %76 = vector.extract_strided_slice %0 {offsets = [4, 0], sizes = [1, 32], strides = [1, 1]} : vector<8x32xf32> to vector<1x32xf32>
    %77 = vector.extract_strided_slice %0 {offsets = [5, 0], sizes = [1, 32], strides = [1, 1]} : vector<8x32xf32> to vector<1x32xf32>
    %cst_32 = arith.constant dense<0.000000e+00> : vector<32xf32>
    %78 = vector.multi_reduction <add>, %75, %cst_32 [1] : vector<32x32xf32> to vector<32xf32>
    %79 = vector.shape_cast %78 : vector<32xf32> to vector<32x1xf32>
    %cst_33 = arith.constant 3.125000e-02 : f32
    %80 = vector.broadcast %cst_33 : f32 to vector<32x1xf32>
    %81 = arith.mulf %79, %80 : vector<32x1xf32>
    %82 = arith.mulf %75, %75 : vector<32x32xf32>
    %cst_34 = arith.constant dense<0.000000e+00> : vector<32xf32>
    %83 = vector.multi_reduction <add>, %82, %cst_34 [1] : vector<32x32xf32> to vector<32xf32>
    %84 = vector.shape_cast %83 : vector<32xf32> to vector<32x1xf32>
    %cst_35 = arith.constant 3.125000e-02 : f32
    %85 = vector.broadcast %cst_35 : f32 to vector<32x1xf32>
    %86 = arith.mulf %84, %85 : vector<32x1xf32>
    %87 = arith.mulf %81, %81 : vector<32x1xf32>
    %88 = arith.subf %86, %87 : vector<32x1xf32>
    %89 = vector.broadcast %81 : vector<32x1xf32> to vector<32x32xf32>
    %90 = arith.subf %75, %89 : vector<32x32xf32>
    %cst_36 = arith.constant 9.99999974E-6 : f32
    %91 = vector.broadcast %cst_36 : f32 to vector<32x1xf32>
    %92 = arith.addf %88, %91 : vector<32x1xf32>
    %93 = math.rsqrt %92 : vector<32x1xf32>
    %94 = vector.broadcast %93 : vector<32x1xf32> to vector<32x32xf32>
    %95 = arith.mulf %90, %94 : vector<32x32xf32>
    %96 = vector.broadcast %76 : vector<1x32xf32> to vector<32x32xf32>
    %97 = arith.mulf %95, %96 : vector<32x32xf32>
    %98 = vector.broadcast %77 : vector<1x32xf32> to vector<32x32xf32>
    %99 = arith.addf %97, %98 : vector<32x32xf32>
    %100 = vector.shape_cast %99 : vector<32x32xf32> to vector<2x16x32xf32>
    %cst_37 = arith.constant dense<0.000000e+00> : vector<2x32xf32>
    %101 = vector.multi_reduction <add>, %100, %cst_37 [1] : vector<2x16x32xf32> to vector<2x32xf32>
    %cst_38 = arith.constant 1.600000e+01 : f32
    %102 = vector.broadcast %cst_38 : f32 to vector<2x32xf32>
    %103 = arith.divf %101, %102 : vector<2x32xf32>
    %c0_39 = arith.constant 0 : index
    %c0_40 = arith.constant 0 : index
    %104 = vector.load %arg6[%c0_39, %c0_40] : memref<2x32xf32, #tpu.memory_space<vmem>>, vector<2x32xf32>
    tpu.vector_store %arg6[%c0_39, %c0_40], %103 {strides = array<i32>} : memref<2x32xf32, #tpu.memory_space<vmem>>, vector<2x32xf32>,
    return
  }
  func.func @transform_0(%arg0: i32) -> (i32, i32) {
    %c0_i32 = arith.constant 0 : i32
    %c0_i32_0 = arith.constant 0 : i32
    %c0_i32_1 = arith.constant 0 : i32
    return %c0_i32, %c0_i32_0 : i32, i32
  }
  func.func @transform_1(%arg0: i32) -> (i32, i32) {
    %c0_i32 = arith.constant 0 : i32
    %c0_i32_0 = arith.constant 0 : i32
    %c0_i32_1 = arith.constant 0 : i32
    return %c0_i32, %c0_i32_0 : i32, i32
  }
  func.func @transform_2(%arg0: i32) -> (i32, i32, i32) {
    %c0_i32 = arith.constant 0 : i32
    %c0_i32_0 = arith.constant 0 : i32
    %c0_i32_1 = arith.constant 0 : i32
    %c0_i32_2 = arith.constant 0 : i32
    return %c0_i32, %c0_i32_0, %c0_i32_1 : i32, i32, i32
  }
  func.func @transform_3(%arg0: i32) -> (i32, i32, i32) {
    %c0_i32 = arith.constant 0 : i32
    %c0_i32_0 = arith.constant 0 : i32
    %c0_i32_1 = arith.constant 0 : i32
    %c0_i32_2 = arith.constant 0 : i32
    return %c0_i32, %c0_i32_0, %c0_i32_1 : i32, i32, i32
  }
  func.func @transform_4(%arg0: i32) -> (i32, i32) {
    %c0_i32 = arith.constant 0 : i32
    %c0_i32_0 = arith.constant 0 : i32
    %c0_i32_1 = arith.constant 0 : i32
    return %c0_i32, %c0_i32_0 : i32, i32
  }
  func.func @transform_5(%arg0: i32) -> (i32, i32) {
    %c0_i32 = arith.constant 0 : i32
    %c0_i32_0 = arith.constant 0 : i32
    %c0_i32_1 = arith.constant 0 : i32
    return %c0_i32, %c0_i32_0 : i32, i32
  }
}

</mosaic_0001>

<bundles_post_ra>
// kernel: warper_clip_v_t_rwkv_forward.1
= control target key start
LH: loop header
LB: loop body
LE: loop exit
PB: predicated region body
PF: predicated region fallthrough
CT: control target
= control target key end

     0   :  { %s1225_s0 = inlined_call_operand.vmem [shape: bf16[32,128], index: 0, kind: input, shape index: {}]   ;;  %s1226_s1 = inlined_call_operand.vmem [shape: bf16[128,32], index: 1, kind: input, shape index: {}]   ;;  %s1227_s2 = inlined_call_operand.vmem [shape: bf16[2,32,64], index: 2, kind: input, shape index: {}]   ;;  %s1228_s3 = inlined_call_operand.vmem [shape: bf16[2,64,32], index: 3, kind: input, shape index: {}]   ;;  %s1229_s4 = inlined_call_operand.vmem [shape: f32[8,32], index: 4, kind: input, shape index: {}]   ;;  %s1230_s5 = inlined_call_operand.hbm [shape: f32[2,32], index: 5, kind: output, shape index: {}]  }
   0x1   :  { %v907_v0 = vld [vmem:[%s1226_s1] sm:$0xff]   ;;  %v908_v1 = vld [vmem:[%s1226_s1 + $0x8] sm:$0xff]   ;;  %v909_v2 = vld [vmem:[%s1226_s1 + $0x10] sm:$0xff]  }
   0x2   :  { %846 = vmatprep.subr.bf16.mxu0 %v907_v0  ;;  %v910_v3 = vld [vmem:[%s1226_s1 + $0x18] sm:$0xff]   ;;  %v915_v4 = vld [vmem:[%s1225_s0] sm:$0xff]   ;;  %v912_v6 = vld [vmem:[%s1226_s1 + $0x28] sm:$0xff]  }
   0x3   :  { %847 = vmatpush3.bf16.msra.mxu0 %v907_v0  ;;  %v911_v5 = vld [vmem:[%s1226_s1 + $0x20] sm:$0xff]   ;;  %862 = vmatprep.mubr.bf16.mxu0 %v915_v4 }
   0x4   :  { %848 = vmatprep.subr.bf16.mxu0 %v908_v1 }
   0x7   :  { %849 = vmatpush3.bf16.msra.mxu0 %v908_v1 }
   0x8   :  { %850 = vmatprep.subr.bf16.mxu0 %v909_v2 }
   0xb   :  { %851 = vmatpush3.bf16.msra.mxu0 %v909_v2 }
   0xc   :  { %852 = vmatprep.subr.bf16.mxu0 %v910_v3 }
   0xf   :  { %853 = vmatpush3.bf16.msra.mxu0 %v910_v3 }
  0x10   :  { %854 = vmatprep.subr.bf16.mxu0 %v911_v5 }
  0x11   :  { %10 = vsyncpa [#allocation3], 0  ;;  %v913_v7 = vld [vmem:[%s1226_s1 + $0x30] sm:$0xff]   ;;  %v914_v8 = vld [vmem:[%s1226_s1 + $0x38] sm:$0xff]   ;;  %vm164_vm0 = vcmask 261120   ;;  %v225_v46 = vlaneseq  ;;  %vm344_vm1 = vcmask 523264  }
  0x12   :  { %v916_v9 = vld [vmem:[%s1225_s0 + $0x8] sm:$0xff]   ;;  %v917_v26 = vld [vmem:[%s1227_s2] sm:$0xff]   ;;  %vm755_vm2 = vcmask 1041409   ;;  %vm758_vm3 = vcmask 254976  }
  0x13   :  { %855 = vmatpush3.bf16.msra.mxu0 %v911_v5  ;;  %v918_v27 = vld [vmem:[%s1227_s2 + $0x8] sm:$0xff]   ;;  %866 = vmatprep.subr.bf16.mxu1 %v917_v26  ;;  %v1075_v28 = vld [vmem:[%s1228_s3] sm:$0xff]   ;;  %v1078_v56 = vshrl.u32 %v225_v46, 7 }
  0x14   :  { %856 = vmatprep.subr.bf16.mxu0 %v912_v6  ;;  %867 = vmatpush3.bf16.msra.mxu1 %v917_v26  ;;  %v1084_v60 = vld [vmem:[%s1229_s4] sm:$0xff]  ;;  %v920_v26 = vld [vmem:[%s1228_s3 + $0x8] sm:$0xff]  }
  0x15   :  { %868 = vmatprep.subr.bf16.mxu1 %v918_v27  ;;  %v227_v59 = vsub.s32 0, %v1078_v56  ;;  %v235_v61 = vsub.s32 1, %v1078_v56 }
  0x17   :  { %857 = vmatpush3.bf16.msra.mxu0 %v912_v6  ;;  %v228_v63 = vrot.slane %v1084_v60, %v227_v59  ;;  %v236_v4 = vrot.slane %v1084_v60, %v235_v61  ;;  %v923_v61 = vld [vmem:[%s1227_s2 + $0x10] sm:$0xff]  }
  0x18   :  { %858 = vmatprep.subr.bf16.mxu0 %v913_v7  ;;  %869 = vmatpush3.bf16.msra.mxu1 %v918_v27  ;;  %v921_v27 = vld [vmem:[%s1228_s3 + $0x10] sm:$0xff]  }
  0x19   :  { %874 = vmatprep.subr.bf16.mxu1 %v1075_v28 }
  0x1b   :  { %859 = vmatpush3.bf16.msra.mxu0 %v913_v7 }
  0x1c   :  { %860 = vmatprep.subr.bf16.mxu0 %v914_v8 }
  0x1f   :  { %861 = vmatpush3.bf16.msra.mxu0 %v914_v8 }
  0x22   :  { %863 = vmatmul.mubr.bf16.vlgmr.msra.gmra.mrb[0].mxu0 %v916_v9 }
  0xf5   :  { %v1038_v10 = vpop.f32.mrb[0].mxu0 }
  0xf6   :  { %v1040_v11 = vpop.f32.mrb[1].mxu0  ;;  %v171_v12 = vsel %vm164_vm0, %v1038_v10, 0.0  ;;  %v183_v23 = vmul.f32 %v1038_v10, %v1038_v10 }
  0xf7   :  { %172 = vadd.xlane.f32.xlu1 %v171_v12  ;;  %v1044_v13 = vpop.f32.mrb[2].mxu0  ;;  %v165_v14 = vsel %vm164_vm0, %v1040_v11, 0.0  ;;  %v181_v19 = vmul.f32 %v1040_v11, %v1040_v11 }
  0xf8   :  { %166 = vadd.xlane.f32.xlu0 %v165_v14  ;;  %v1048_v15 = vpop.f32.mrb[3].mxu0  ;;  %v174_v16 = vsel %vm164_vm0, %v1044_v13, 0.0  ;;  %v184_v21 = vmul.f32 %v1044_v13, %v1044_v13  ;;  %v191_v25 = vsel %vm164_vm0, %v183_v23, 0.0 }
  0xf9   :  { %v182_v17 = vmul.f32 %v1048_v15, %v1048_v15  ;;  %v168_v18 = vsel %vm164_vm0, %v1048_v15, 0.0  ;;  %v185_v22 = vsel %vm164_vm0, %v181_v19, 0.0 }
  0xfa   :  { %v194_v24 = vsel %vm164_vm0, %v184_v21, 0.0 }
  0xfb   :  { %175 = vadd.xlane.f32.xlu1 %v174_v16  ;;  %v188_v20 = vsel %vm164_vm0, %v182_v17, 0.0 }
  0xfc   :  { %169 = vadd.xlane.f32.xlu0 %v168_v18 }
  0xff   :  { %189 = vadd.xlane.f32.xlu1 %v188_v20 }
 0x100   :  { %186 = vadd.xlane.f32.xlu0 %v185_v22 }
 0x103   :  { %195 = vadd.xlane.f32.xlu1 %v194_v24 }
 0x104   :  { %192 = vadd.xlane.f32.xlu0 %v191_v25 }
 0x184   :  { %v173_v29 = vpop.xlane.xlu1 %172 }
 0x185   :  { %v167_v30 = vpop.xlane.xlu0 %166  ;;  %v179_v40 = vmul.f32 0.03125, %v173_v29  ;;  %v922_v29 = vld [vmem:[%s1228_s3 + $0x18] sm:$0xff]  }
 0x186   :  { %v177_v33 = vmul.f32 0.03125, %v167_v30 }
 0x187   :  { %v203_v51 = vmul.f32 %v179_v40, %v179_v40  ;;  %v211_v9 = vsub.f32 %v1038_v10, %v179_v40 }
 0x188   :  { %v176_v31 = vpop.xlane.xlu1 %175  ;;  %v201_v41 = vmul.f32 %v177_v33, %v177_v33  ;;  %v209_v1 = vsub.f32 %v1040_v11, %v177_v33 }
 0x189   :  { %v170_v32 = vpop.xlane.xlu0 %169  ;;  %v180_v37 = vmul.f32 0.03125, %v176_v31 }
 0x18a   :  { %v178_v34 = vmul.f32 0.03125, %v170_v32 }
 0x18b   :  { %v204_v47 = vmul.f32 %v180_v37, %v180_v37  ;;  %v212_v6 = vsub.f32 %v1044_v13, %v180_v37 }
 0x18c   :  { %v202_v35 = vmul.f32 %v178_v34, %v178_v34  ;;  %v190_v36 = vpop.xlane.xlu1 %189  ;;  %v210_v62 = vsub.f32 %v1048_v15, %v178_v34 }
 0x18d   :  { %v198_v38 = vmul.f32 0.03125, %v190_v36  ;;  %v187_v39 = vpop.xlane.xlu0 %186 }
 0x18e   :  { %v197_v42 = vmul.f32 0.03125, %v187_v39 }
 0x18f   :  { %v206_v43 = vsub.f32 %v198_v38, %v202_v35 }
 0x190   :  { %v205_v44 = vsub.f32 %v197_v42, %v201_v41  ;;  %v196_v45 = vpop.xlane.xlu1 %195 }
 0x191   :  { %v214_v48 = vadd.f32 1e-05, %v206_v43  ;;  %v200_v49 = vmul.f32 0.03125, %v196_v45  ;;  %v193_v50 = vpop.xlane.xlu0 %192 }
 0x192   :  { %v213_v52 = vadd.f32 1e-05, %v205_v44  ;;  %v199_v53 = vmul.f32 0.03125, %v193_v50 }
 0x193   :  { %929 = vrsqrt.f32 %v214_v48  ;;  %v208_v54 = vsub.f32 %v200_v49, %v204_v47 }
 0x194   :  { %931 = vrsqrt.f32 %v213_v52  ;;  %v207_v55 = vsub.f32 %v199_v53, %v203_v51 }
 0x195   :  { %v216_v57 = vadd.f32 1e-05, %v208_v54 }
 0x196   :  { %v215_v58 = vadd.f32 1e-05, %v207_v55 }
 0x197   :  { %933 = vrsqrt.f32 %v216_v57 }
 0x198   :  { %935 = vrsqrt.f32 %v215_v58 }
 0x19d   :  { %v930_v0 = vpop.eup %929 }
 0x19e   :  { %v932_v2 = vpop.eup %931  ;;  %v222_v3 = vmul.f32 %v930_v0, %v210_v62  ;;  %v924_v62 = vld [vmem:[%s1227_s2 + $0x18] sm:$0xff]   ;;  %v926_v0 = vld [vmem:[%s1228_s3 + $0x28] sm:$0xff]  }
 0x19f   :  { %v221_v5 = vmul.f32 %v932_v2, %v209_v1 }
 0x1a0   :  { %v230_v7 = vmul.f32 %v228_v63, %v222_v3 }
 0x1a1   :  { %v934_v8 = vpop.eup %933  ;;  %v229_v12 = vmul.f32 %v228_v63, %v221_v5 }
 0x1a2   :  { %v936_v14 = vpop.eup %935  ;;  %v238_v16 = vadd.f32 %v236_v4, %v230_v7  ;;  %v224_v17 = vmul.f32 %v934_v8, %v212_v6 }
 0x1a3   :  { %v237_v18 = vadd.f32 %v236_v4, %v229_v12  ;;  %v223_v19 = vmul.f32 %v936_v14, %v211_v9 }
 0x1a4   :  { %v232_v20 = vmul.f32 %v228_v63, %v224_v17 }
 0x1a5   :  { %v241_v21 = vpack.c.bf16 %v238_v16, %v237_v18  ;;  %v231_v22 = vmul.f32 %v228_v63, %v223_v19  ;;  %v925_v63 = vld [vmem:[%s1228_s3 + $0x20] sm:$0xff]  }
 0x1a6   :  { %v240_v23 = vadd.f32 %v236_v4, %v232_v20  ;;  %894 = vmatprep.subr.bf16.mxu0 %v925_v63 }
 0x1a7   :  { %870 = vmatprep.mubr.msk.bf16.mxu1 %vm164_vm0, %v241_v21  ;;  %v239_v24 = vadd.f32 %v236_v4, %v231_v22  ;;  %895 = vmatpush3.bf16.msra.mxu0 %v925_v63 }
 0x1a8   :  { %896 = vmatprep.subr.bf16.mxu0 %v926_v0 }
 0x1a9   :  { %v242_v25 = vpack.c.bf16 %v240_v23, %v239_v24 }
 0x1ab   :  { %871 = vmatmul.mubr.msk.bf16.vlgmr.msra.gmra.mrb[0].mxu1 %vm164_vm0, %v242_v25  ;;  %897 = vmatpush3.bf16.msra.mxu0 %v926_v0 }
 0x1ac   :  { %875 = vmatpush3.bf16.msra.mxu1 %v1075_v28 }
 0x1ad   :  { %876 = vmatprep.subr.bf16.mxu1 %v920_v26 }
 0x1b0   :  { %877 = vmatpush3.bf16.msra.mxu1 %v920_v26 }
 0x1b1   :  { %878 = vmatprep.subr.bf16.mxu1 %v921_v27 }
 0x1b4   :  { %879 = vmatpush3.bf16.msra.mxu1 %v921_v27 }
 0x1b5   :  { %880 = vmatprep.subr.bf16.mxu1 %v922_v29 }
 0x1b8   :  { %881 = vmatpush3.bf16.msra.mxu1 %v922_v29 }
 0x1b9   :  { %886 = vmatprep.subr.bf16.mxu1 %v923_v61 }
 0x27e   :  { %v872_v30 = vpop.f32.mrb[0].mxu1 }
 0x27f   :  { %v312_v31 = vmax.f32 %v872_v30, 0.0  ;;  %v295_v32 = vpop.f32.mrb[1].mxu1 }
 0x280   :  { %v310_v33 = vmax.f32 %v295_v32, 0.0  ;;  %v873_v34 = vpop.f32.mrb[2].mxu1 }
 0x281   :  { %v313_v28 = vmax.f32 %v873_v34, 0.0  ;;  %v298_v35 = vpop.f32.mrb[3].mxu1  ;;  %v316_v37 = vmul.f32 %v312_v31, %v312_v31  ;;  %v480_v34 = vsub.s32 2, %v1078_v56 }
 0x282   :  { %v311_v36 = vmax.f32 %v298_v35, 0.0  ;;  %v314_v39 = vmul.f32 %v310_v33, %v310_v33 }
 0x283   :  { %v317_v38 = vmul.f32 %v313_v28, %v313_v28  ;;  %v481_v35 = vrot.slane %v1084_v60, %v480_v34 }
 0x284   :  { %v315_v40 = vmul.f32 %v311_v36, %v311_v36  ;;  %v488_v36 = vsub.s32 3, %v1078_v56 }
 0x285   :  { %v319_v41 = vpack.c.bf16 %v317_v38, %v316_v37 }
 0x286   :  { %v318_v42 = vpack.c.bf16 %v315_v40, %v314_v39 }
 0x288   :  { %882 = vmatprep.mubr.msk.bf16.mxu1 %vm344_vm1, %v318_v42 }
 0x289   :  { %883 = vmatmul.mubr.msk.bf16.vlgmr.msra.gmra.mrb[4].mxu1 %vm344_vm1, %v319_v41 }
 0x28a   :  { %887 = vmatpush3.bf16.msra.mxu1 %v923_v61  ;;  %v927_v61 = vld [vmem:[%s1228_s3 + $0x30] sm:$0xff]  }
 0x28b   :  { %888 = vmatprep.subr.bf16.mxu1 %v924_v62  ;;  %898 = vmatprep.subr.bf16.mxu0 %v927_v61 }
 0x28c   :  { %899 = vmatpush3.bf16.msra.mxu0 %v927_v61 }
 0x28e   :  { %889 = vmatpush3.bf16.msra.mxu1 %v924_v62  ;;  %v928_v62 = vld [vmem:[%s1228_s3 + $0x38] sm:$0xff]   ;;  %s977_s3 = smov [#allocation2]  }
 0x28f   :  { %900 = vmatprep.subr.bf16.mxu0 %v928_v62  ;;  %s766_s10 = sshll.u32 %s977_s3, 4  ;;  %s767_s10 = int_to_ptr.vmem [resolvable:$true] %s766_s10 }
 0x290   :  { %901 = vmatpush3.bf16.msra.mxu0 %v928_v62  ;;  %s953_s11 = scalar_lea.vmem %s767_s10, 32  ;;  %p958_p1 = scmp.lt.s32.totalorder %s767_s10, %s767_s10 }
 0x291   :  { %p954_p0 = scmp.ne.s32.totalorder %s767_s10, %s953_s11  ;;  %p959_p2 = scmp.lt.s32.totalorder %s953_s11, %s953_s11 }
 0x293   :  { %p960_p3 = por %p959_p2, %p958_p1 }
 0x295   :  { %p961_p4 = pnand %p960_p3, %p954_p0 }
 0x35c   :  { %v884_v43 = vpop.f32.mrb[4].mxu1 }
 0x35d   :  { %v1108_v44 = vadd.f32 %v884_v43, %v1038_v10  ;;  %v385_v45 = vpop.f32.mrb[5].mxu1 }
 0x35e   :  { %v1111_v46 = vadd.f32 %v385_v45, %v1040_v11  ;;  %v885_v47 = vpop.f32.mrb[6].mxu1  ;;  %v489_v45 = vrot.slane %v1084_v60, %v488_v36 }
 0x35f   :  { %v1114_v48 = vadd.f32 %v885_v47, %v1044_v13  ;;  %v388_v49 = vpop.f32.mrb[7].mxu1  ;;  %v424_v50 = vsel %vm164_vm0, %v1108_v44, 0.0  ;;  %v436_v54 = vmul.f32 %v1108_v44, %v1108_v44 }
 0x360   :  { %v1119_v51 = vadd.f32 %v388_v49, %v1048_v15  ;;  %425 = vadd.xlane.f32.xlu0 %v424_v50  ;;  %v418_v11 = vsel %vm164_vm0, %v1111_v46, 0.0  ;;  %v434_v52 = vmul.f32 %v1111_v46, %v1111_v46 }
 0x361   :  { %v427_v10 = vsel %vm164_vm0, %v1114_v48, 0.0  ;;  %v437_v57 = vmul.f32 %v1114_v48, %v1114_v48  ;;  %v444_v58 = vsel %vm164_vm0, %v436_v54, 0.0 }
 0x362   :  { %428 = vadd.xlane.f32.xlu1 %v427_v10  ;;  %v421_v13 = vsel %vm164_vm0, %v1119_v51, 0.0  ;;  %v435_v53 = vmul.f32 %v1119_v51, %v1119_v51  ;;  %v438_v15 = vsel %vm164_vm0, %v434_v52, 0.0 }
 0x363   :  { %v447_v59 = vsel %vm164_vm0, %v437_v57, 0.0 }
 0x364   :  { %419 = vadd.xlane.f32.xlu0 %v418_v11  ;;  %v441_v55 = vsel %vm164_vm0, %v435_v53, 0.0 }
 0x366   :  { %422 = vadd.xlane.f32.xlu1 %v421_v13 }
 0x368   :  { %439 = vadd.xlane.f32.xlu0 %v438_v15 }
 0x36a   :  { %442 = vadd.xlane.f32.xlu1 %v441_v55 }
 0x36c   :  { %445 = vadd.xlane.f32.xlu0 %v444_v58 }
 0x36e   :  { %448 = vadd.xlane.f32.xlu1 %v447_v59 }
 0x3ed   :  { %v426_v1 = vpop.xlane.xlu0 %425 }
 0x3ee   :  { %v432_v8 = vmul.f32 0.03125, %v426_v1 }
 0x3ef   :  { %v429_v2 = vpop.xlane.xlu1 %428 }
 0x3f0   :  { %v433_v14 = vmul.f32 0.03125, %v429_v2  ;;  %v456_v21 = vmul.f32 %v432_v8, %v432_v8  ;;  %v464_v41 = vsub.f32 %v1108_v44, %v432_v8 }
 0x3f1   :  { %v420_v3 = vpop.xlane.xlu0 %419 }
 0x3f2   :  { %v430_v4 = vmul.f32 0.03125, %v420_v3  ;;  %v457_v25 = vmul.f32 %v433_v14, %v433_v14  ;;  %v465_v49 = vsub.f32 %v1114_v48, %v433_v14 }
 0x3f3   :  { %v423_v5 = vpop.xlane.xlu1 %422 }
 0x3f4   :  { %v431_v6 = vmul.f32 0.03125, %v423_v5  ;;  %v454_v9 = vmul.f32 %v430_v4, %v430_v4  ;;  %v462_v28 = vsub.f32 %v1111_v46, %v430_v4 }
 0x3f5   :  { %v440_v7 = vpop.xlane.xlu0 %439 }
 0x3f6   :  { %v450_v12 = vmul.f32 0.03125, %v440_v7  ;;  %v455_v17 = vmul.f32 %v431_v6, %v431_v6  ;;  %v463_v38 = vsub.f32 %v1119_v51, %v431_v6 }
 0x3f7   :  { %v443_v16 = vpop.xlane.xlu1 %442 }
 0x3f8   :  { %v458_v18 = vsub.f32 %v450_v12, %v454_v9  ;;  %v451_v19 = vmul.f32 0.03125, %v443_v16 }
 0x3f9   :  { %v446_v20 = vpop.xlane.xlu0 %445 }
 0x3fa   :  { %v466_v22 = vadd.f32 1e-05, %v458_v18  ;;  %v459_v23 = vsub.f32 %v451_v19, %v455_v17  ;;  %v452_v24 = vmul.f32 0.03125, %v446_v20 }
 0x3fb   :  { %v449_v26 = vpop.xlane.xlu1 %448 }
 0x3fc   :  { %937 = vrsqrt.f32 %v466_v22  ;;  %v467_v27 = vadd.f32 1e-05, %v459_v23  ;;  %v460_v29 = vsub.f32 %v452_v24, %v456_v21  ;;  %v453_v30 = vmul.f32 0.03125, %v449_v26 }
 0x3fe   :  { %939 = vrsqrt.f32 %v467_v27  ;;  %v468_v31 = vadd.f32 1e-05, %v460_v29  ;;  %v461_v32 = vsub.f32 %v453_v30, %v457_v25 }
 0x400   :  { %941 = vrsqrt.f32 %v468_v31  ;;  %v469_v33 = vadd.f32 1e-05, %v461_v32 }
 0x402   :  { %943 = vrsqrt.f32 %v469_v33 }
 0x406   :  { %v938_v37 = vpop.eup %937 }
 0x407   :  { %v474_v39 = vmul.f32 %v938_v37, %v462_v28 }
 0x408   :  { %v940_v40 = vpop.eup %939 }
 0x409   :  { %v475_v42 = vmul.f32 %v940_v40, %v463_v38  ;;  %v482_v43 = vmul.f32 %v481_v35, %v474_v39 }
 0x40a   :  { %v942_v47 = vpop.eup %941 }
 0x40b   :  { %v476_v50 = vmul.f32 %v942_v47, %v464_v41  ;;  %v483_v10 = vmul.f32 %v481_v35, %v475_v42  ;;  %v490_v13 = vadd.f32 %v489_v45, %v482_v43 }
 0x40c   :  { %v944_v11 = vpop.eup %943 }
 0x40d   :  { %v477_v52 = vmul.f32 %v944_v11, %v465_v49  ;;  %v491_v53 = vadd.f32 %v489_v45, %v483_v10  ;;  %v484_v15 = vmul.f32 %v481_v35, %v476_v50 }
 0x40f   :  { %v494_v54 = vpack.c.bf16 %v491_v53, %v490_v13  ;;  %v485_v55 = vmul.f32 %v481_v35, %v477_v52  ;;  %v492_v57 = vadd.f32 %v489_v45, %v484_v15 }
 0x411   :  { %890 = vmatprep.mubr.msk.bf16.mxu1 %vm164_vm0, %v494_v54  ;;  %v493_v58 = vadd.f32 %v489_v45, %v485_v55 }
 0x413   :  { %v495_v59 = vpack.c.bf16 %v493_v58, %v492_v57 }
 0x415   :  { %891 = vmatmul.mubr.msk.bf16.vlgmr.msra.gmra.mrb[8].mxu1 %vm164_vm0, %v495_v59 }
 0x4e8   :  { %v892_v63 = vpop.f32.mrb[8].mxu1 }
 0x4e9   :  { %v565_v0 = vmax.f32 %v892_v63, 0.0  ;;  %v548_v1 = vpop.f32.mrb[9].mxu1  ;;  %v718_v63 = vsub.s32 4, %v1078_v56 }
 0x4ea   :  { %v563_v2 = vmax.f32 %v548_v1, 0.0  ;;  %v893_v3 = vpop.f32.mrb[10].mxu1 }
 0x4eb   :  { %v566_v4 = vmax.f32 %v893_v3, 0.0  ;;  %v551_v5 = vpop.f32.mrb[11].mxu1  ;;  %v569_v7 = vmul.f32 %v565_v0, %v565_v0  ;;  %v726_v0 = vsub.s32 5, %v1078_v56 }
 0x4ec   :  { %v564_v6 = vmax.f32 %v551_v5, 0.0  ;;  %v567_v9 = vmul.f32 %v563_v2, %v563_v2  ;;  %v719_v2 = vrot.slane %v1084_v60, %v718_v63 }
 0x4ed   :  { %v570_v8 = vmul.f32 %v566_v4, %v566_v4 }
 0x4ee   :  { %v568_v12 = vmul.f32 %v564_v6, %v564_v6  ;;  %v727_v6 = vrot.slane %v1084_v60, %v726_v0 }
 0x4ef   :  { %v572_v14 = vpack.c.bf16 %v570_v8, %v569_v7 }
 0x4f0   :  { %v571_v16 = vpack.c.bf16 %v568_v12, %v567_v9 }
 0x4f2   :  { %902 = vmatprep.mubr.msk.bf16.mxu0 %vm344_vm1, %v571_v16 }
 0x4f3   :  { %903 = vmatmul.mubr.msk.bf16.vlgmr.msra.gmra.mrb[4].mxu0 %vm344_vm1, %v572_v14 }
 0x5c6   :  { %v904_v17 = vpop.f32.mrb[4].mxu0 }
 0x5c7   :  { %v1170_v18 = vadd.f32 %v904_v17, %v1108_v44  ;;  %v637_v19 = vpop.f32.mrb[5].mxu0 }
 0x5c8   :  { %v905_v20 = vpop.f32.mrb[6].mxu0  ;;  %v1173_v21 = vadd.f32 %v637_v19, %v1111_v46 }
 0x5c9   :  { %v1176_v22 = vadd.f32 %v905_v20, %v1114_v48  ;;  %v640_v23 = vpop.f32.mrb[7].mxu0  ;;  %v662_v24 = vsel %vm164_vm0, %v1170_v18, 0.0  ;;  %v674_v29 = vmul.f32 %v1170_v18, %v1170_v18 }
 0x5ca   :  { %663 = vadd.xlane.f32.xlu0 %v662_v24  ;;  %v1181_v25 = vadd.f32 %v640_v23, %v1119_v51  ;;  %v656_v26 = vsel %vm164_vm0, %v1173_v21, 0.0  ;;  %v672_v46 = vmul.f32 %v1173_v21, %v1173_v21 }
 0x5cb   :  { %v665_v44 = vsel %vm164_vm0, %v1176_v22, 0.0  ;;  %v675_v31 = vmul.f32 %v1176_v22, %v1176_v22  ;;  %v682_v32 = vsel %vm164_vm0, %v674_v29, 0.0 }
 0x5cc   :  { %666 = vadd.xlane.f32.xlu1 %v665_v44  ;;  %v659_v48 = vsel %vm164_vm0, %v1181_v25, 0.0  ;;  %v673_v27 = vmul.f32 %v1181_v25, %v1181_v25  ;;  %v676_v51 = vsel %vm164_vm0, %v672_v46, 0.0 }
 0x5cd   :  { %v685_v33 = vsel %vm164_vm0, %v675_v31, 0.0 }
 0x5ce   :  { %657 = vadd.xlane.f32.xlu0 %v656_v26  ;;  %v679_v30 = vsel %vm164_vm0, %v673_v27, 0.0 }
 0x5d0   :  { %660 = vadd.xlane.f32.xlu1 %v659_v48 }
 0x5d2   :  { %677 = vadd.xlane.f32.xlu0 %v676_v51 }
 0x5d4   :  { %680 = vadd.xlane.f32.xlu1 %v679_v30 }
 0x5d6   :  { %683 = vadd.xlane.f32.xlu0 %v682_v32 }
 0x5d8   :  { %686 = vadd.xlane.f32.xlu1 %v685_v33 }
 0x657   :  { %v664_v34 = vpop.xlane.xlu0 %663 }
 0x658   :  { %v670_v40 = vmul.f32 0.03125, %v664_v34 }
 0x659   :  { %v667_v28 = vpop.xlane.xlu1 %666 }
 0x65a   :  { %v671_v43 = vmul.f32 0.03125, %v667_v28  ;;  %v694_v11 = vmul.f32 %v670_v40, %v670_v40  ;;  %v702_v8 = vsub.f32 %v1170_v18, %v670_v40 }
 0x65b   :  { %v658_v35 = vpop.xlane.xlu0 %657 }
 0x65c   :  { %v668_v36 = vmul.f32 0.03125, %v658_v35  ;;  %v695_v15 = vmul.f32 %v671_v43, %v671_v43  ;;  %v703_v16 = vsub.f32 %v1176_v22, %v671_v43 }
 0x65d   :  { %v661_v37 = vpop.xlane.xlu1 %660 }
 0x65e   :  { %v669_v38 = vmul.f32 0.03125, %v661_v37  ;;  %v692_v41 = vmul.f32 %v668_v36, %v668_v36  ;;  %v700_v1 = vsub.f32 %v1173_v21, %v668_v36 }
 0x65f   :  { %v678_v39 = vpop.xlane.xlu0 %677 }
 0x660   :  { %v688_v42 = vmul.f32 0.03125, %v678_v39  ;;  %v693_v47 = vmul.f32 %v669_v38, %v669_v38  ;;  %v701_v4 = vsub.f32 %v1181_v25, %v669_v38 }
 0x661   :  { %v681_v45 = vpop.xlane.xlu1 %680 }
 0x662   :  { %v696_v49 = vsub.f32 %v688_v42, %v692_v41  ;;  %v689_v50 = vmul.f32 0.03125, %v681_v45 }
 0x663   :  { %v684_v10 = vpop.xlane.xlu0 %683 }
 0x664   :  { %v704_v52 = vadd.f32 1e-05, %v696_v49  ;;  %v697_v13 = vsub.f32 %v689_v50, %v693_v47  ;;  %v690_v53 = vmul.f32 0.03125, %v684_v10 }
 0x665   :  { %v687_v54 = vpop.xlane.xlu1 %686 }
 0x666   :  { %945 = vrsqrt.f32 %v704_v52  ;;  %v705_v55 = vadd.f32 1e-05, %v697_v13  ;;  %v698_v57 = vsub.f32 %v690_v53, %v694_v11  ;;  %v691_v58 = vmul.f32 0.03125, %v687_v54 }
 0x668   :  { %947 = vrsqrt.f32 %v705_v55  ;;  %v706_v59 = vadd.f32 1e-05, %v698_v57  ;;  %v699_v61 = vsub.f32 %v691_v58, %v695_v15 }
 0x66a   :  { %949 = vrsqrt.f32 %v706_v59  ;;  %v707_v62 = vadd.f32 1e-05, %v699_v61 }
 0x66c   :  { %951 = vrsqrt.f32 %v707_v62 }
 0x670   :  { %v946_v3 = vpop.eup %945 }
 0x671   :  { %v712_v5 = vmul.f32 %v946_v3, %v700_v1 }
 0x672   :  { %v948_v7 = vpop.eup %947 }
 0x673   :  { %v720_v9 = vmul.f32 %v719_v2, %v712_v5  ;;  %v713_v12 = vmul.f32 %v948_v7, %v701_v4 }
 0x674   :  { %v950_v14 = vpop.eup %949 }
 0x675   :  { %v721_v17 = vmul.f32 %v719_v2, %v713_v12  ;;  %v714_v56 = vmul.f32 %v950_v14, %v702_v8  ;;  %v728_v19 = vadd.f32 %v727_v6, %v720_v9 }
 0x676   :  { %v952_v20 = vpop.eup %951 }
 0x677   :  { %v722_v21 = vmul.f32 %v719_v2, %v714_v56  ;;  %v715_v23 = vmul.f32 %v952_v20, %v703_v16  ;;  %v729_v24 = vadd.f32 %v727_v6, %v721_v17  ;;  %v732_v26 = vsel %vm164_vm0, %v728_v19, 0.0 }
 0x679   :  { %v723_v44 = vmul.f32 %v719_v2, %v715_v23  ;;  %v730_v25 = vadd.f32 %v727_v6, %v722_v21  ;;  %v733_v60 = vsel %vm164_vm0, %v729_v24, 0.0 }
 0x67a   :  { %v734_v46 = vadd.f32 %v733_v60, %v732_v26 }
 0x67b   :  { %v731_v18 = vadd.f32 %v727_v6, %v723_v44  ;;  %v741_v27 = vsel %vm164_vm0, %v730_v25, 0.0 }
 0x67c   :  { %v735_v48 = vrot.slane %v734_v46, 4 }
 0x67d   :  { %v742_v22 = vsel %vm164_vm0, %v731_v18, 0.0 }
 0x67e   :  { %v736_v51 = vadd.f32 %v735_v48, %v734_v46  ;;  %v743_v29 = vadd.f32 %v742_v22, %v741_v27 }
 0x680   :  { %v737_v30 = vrot.slane %v736_v51, 2  ;;  %v744_v31 = vrot.slane %v743_v29, 4 }
 0x682   :  { %v738_v32 = vadd.f32 %v737_v30, %v736_v51  ;;  %v745_v33 = vadd.f32 %v744_v31, %v743_v29 }
 0x684   :  { %v739_v34 = vrot.slane %v738_v32, 1  ;;  %v746_v28 = vrot.slane %v745_v33, 2 }
 0x686   :  { %v747_v35 = vadd.f32 %v746_v28, %v745_v33  ;;  %v740_v36 = vadd.f32 %v739_v34, %v738_v32 }
 0x688   :  { %v748_v37 = vrot.slane %v747_v35, 1  ;;  %v751_v39 = vmul.f32 0.0625, %v740_v36 }
 0x68a   :  { %v749_v38 = vadd.f32 %v748_v37, %v747_v35 }
 0x68c   :  { %v752_v40 = vmul.f32 0.0625, %v749_v38 }
 0x68e   :  { %v756_v41 = vsel %vm755_vm2, %v752_v40, %v751_v39 }
 0x68f   :  { %759 = vst.msk [vmem:[#allocation2] sm:$0x3] %vm758_vm3, %v756_v41 }
 0x690   :  { %964 = shalt.err (!%p961_p4)
}
 0x691   :  { %s965_s1 = scalar_lea.hbm %s1230_s5, 32 }
 0x692   :  { %p966_p5 = scmp.ne.s32.totalorder %s1230_s5, %s965_s1  ;;  %p969_p6 = scmp.lt.u32.totalorder %s965_s1, %s1230_s5 }
 0x694   :  { %p971_p7 = pnand %p969_p6, %p966_p5 }
 0x696   :  { %974 = shalt.err (!%p971_p7)
}
 0x697   :  { %769 = dma.vmem_to_hbm [thread:$0]  %s767_s10, 32, %s1230_s5, [#allocation3]  }
 0x698   :  { %975 = dma.done.wait [#allocation3], 32  }
 0x699   :  { %976 = vsyncadd [#allocation3], 4294967264 }
 0x69a   :  { %773 = vsyncpa [#allocation3], 1 }

</bundles_post_ra>
